<compile_context>
chip_gen: v5e
topology: v5e:2x2
jax: 0.10.0
libtpu: 0.0.40
codegen_flags: <defaults>
</compile_context>

<pallas_src>
import functools

import jax
import jax.numpy as jnp
from jax.experimental import pallas as pl
from jax.experimental.pallas import tpu as pltpu

EPS = 1e-5                                  # nn.LayerNorm default eps
_LANES = 128


# ---------------------------------------------------------------------------
# Hardware-aware configuration
# ---------------------------------------------------------------------------
def _vmem_budgets():
    """(scoped vmem limit, fused-path planning budget), generation aware."""
    cap = None
    try:
        cap = pltpu.get_tpu_info().vmem_capacity_bytes
    except Exception:
        cap = None
    if not cap or cap <= 0:
        cap = 64 * 1024 * 1024              # conservative default (v7x per-TC size)
    limit = min((cap * 3) // 4, 96 * 1024 * 1024)   # ~96 MiB on 128 MiB parts, ~48 MiB on v7x
    budget = min(cap // 2, 64 * 1024 * 1024)        # ~64 MiB / ~32 MiB
    return int(limit), int(budget)


def _is_multi_core_chip():
    """True for chips with 2 TensorCores (v7x): prefer grids with >= 2 parallel steps."""
    try:
        kind = jax.devices()[0].device_kind.lower()
    except Exception:
        return False
    return ("v7" in kind) or ("7x" in kind) or ("tpu7" in kind)


def _compiler_params(dim_sem, vmem_limit):
    cls = getattr(pltpu, "CompilerParams", None) or getattr(pltpu, "TPUCompilerParams")
    return cls(dimension_semantics=dim_sem, vmem_limit_bytes=vmem_limit)


def _round_up(a, m):
    return ((a + m - 1) // m) * m


# ---------------------------------------------------------------------------
# Kernels
# ---------------------------------------------------------------------------
def _fused_kernel(x_ref, gamma_ref, o_ref):
    """Single-pass whole-(L, C)-slab path.  No staging scratch."""
    x = x_ref[...].astype(jnp.float32)           # (L, C)
    g = gamma_ref[...].astype(jnp.float32)       # (1, C)
    seq_len, channels = x.shape
    mean = jnp.sum(x, axis=-1, keepdims=True) * (1.0 / channels)
    xc = x - mean                                # centered form (no E[x^2]-E[x]^2 cancellation)
    var = jnp.sum(xc * xc, axis=-1, keepdims=True) * (1.0 / channels)
    z = xc * jax.lax.rsqrt(var + EPS)            # normalized, pre-affine
    zbar = jnp.sum(z, axis=0, keepdims=True) * (1.0 / seq_len)   # mean over L
    o_ref[...] = ((z - zbar) * g).astype(o_ref.dtype)            # = x_hat - bias (beta cancels)


def _fused_packed_kernel(x_ref, gamma_ref, tok_ref, chan_ref, o_ref, *, channels, pack):
    """Lane-dense path for C < 128: `pack` tokens per 128-lane row.

    Lane a of a row holds token-slot a // channels, channel a % channels.
    tok_ref : (128,128) 0/1, tok[a,a']  = 1 iff lanes a, a' belong to the same token slot.
    chan_ref: (128,128) 0/1, chan[a,a'] = 1 iff lanes a, a' hold the same channel.
    Both are constants hoisted out of the kernel (the grid re-executes the body each step).
    """
    hi = jax.lax.Precision.HIGHEST               # keep the 0/1 matmuls exact in f32
    x = x_ref[...].astype(jnp.float32)           # (Lp, 128)
    g = gamma_ref[...].astype(jnp.float32)       # (1, 128)
    tok = tok_ref[...]
    chan = chan_ref[...]
    rows = x.shape[0]
    inv_c = 1.0 / channels
    # Per-token mean / variance, broadcast over the token's lanes via the (idle) MXU.
    mean = jnp.dot(x, tok, precision=hi, preferred_element_type=jnp.float32) * inv_c
    xc = x - mean
    var = jnp.dot(xc * xc, tok, precision=hi, preferred_element_type=jnp.float32) * inv_c
    z = xc * jax.lax.rsqrt(var + EPS)
    # Mean over the sequence axis: packed rows first, then the pack slots sharing a channel.
    col_sum = jnp.sum(z, axis=0, keepdims=True)                              # (1, 128)
    zbar = jnp.dot(col_sum, chan, precision=hi,
                   preferred_element_type=jnp.float32) * (1.0 / (rows * pack))
    o_ref[...] = ((z - zbar) * g).astype(o_ref.dtype)


def _zsum_kernel(x_ref, psum_ref, *, seq_len, tile_l):
    """Two-pass, pass 1: per-channel sums of z over a (TL, C) tile (tail rows masked)."""
    x = x_ref[...].astype(jnp.float32)           # (TL, C)
    channels = x.shape[-1]
    mean = jnp.sum(x, axis=-1, keepdims=True) * (1.0 / channels)
    xc = x - mean
    var = jnp.sum(xc * xc, axis=-1, keepdims=True) * (1.0 / channels)
    z = xc * jax.lax.rsqrt(var + EPS)
    if seq_len % tile_l != 0:                    # cdiv grid: mask padded tail rows (trace-time check)
        row = pl.program_id(1) * tile_l + jax.lax.broadcasted_iota(jnp.int32, z.shape, 0)
        z = jnp.where(row < seq_len, z, 0.0)
    sums = jnp.sum(z, axis=0, keepdims=True)     # (1, C)
    # Replicate (scaled by 1/8) across 8 sublanes so the out block stays (8, C)-aligned
    # and a plain sum over the padded axis recovers the tile total.
    psum_ref[...] = jnp.broadcast_to(sums * 0.125, psum_ref.shape)


def _apply_kernel(x_ref, gamma_ref, zbar_ref, o_ref):
    """Two-pass, pass 2: re-read x, recompute stats (compute is free), write gamma*(z - zbar)."""
    x = x_ref[...].astype(jnp.float32)           # (TL, C)
    g = gamma_ref[...].astype(jnp.float32)       # (1, C)
    zbar = zbar_ref[...]                         # (1, C) f32
    channels = x.shape[-1]
    mean = jnp.sum(x, axis=-1, keepdims=True) * (1.0 / channels)
    xc = x - mean
    var = jnp.sum(xc * xc, axis=-1, keepdims=True) * (1.0 / channels)
    z = xc * jax.lax.rsqrt(var + EPS)
    o_ref[...] = ((z - zbar) * g).astype(o_ref.dtype)


# ---------------------------------------------------------------------------
# pallas_call wrappers
# ---------------------------------------------------------------------------
def _fused_call(x, gamma, vmem_limit):
    B, L, C = x.shape
    return pl.pallas_call(
        _fused_kernel,
        out_shape=jax.ShapeDtypeStruct((B, L, C), x.dtype),
        grid=(B,),
        in_specs=[
            pl.BlockSpec((None, L, C), lambda b: (b, 0, 0)),
            pl.BlockSpec((1, C), lambda b: (0, 0)),
        ],
        out_specs=pl.BlockSpec((None, L, C), lambda b: (b, 0, 0)),
        compiler_params=_compiler_params(("parallel",), vmem_limit),
    )(x, gamma.reshape(1, C))


def _fused_packed_call(x, gamma, pack, vmem_limit):
    B, L, C = x.shape
    lp = L // pack
    xp = x.reshape(B, lp, _LANES)                # contiguous reshape: free layout plumbing
    gamma_p = jnp.tile(gamma.reshape(1, C).astype(jnp.float32), (1, pack))  # lane a -> gamma[a % C]
    lanes = jnp.arange(_LANES)
    tok = (lanes[:, None] // C == lanes[None, :] // C).astype(jnp.float32)   # same token slot
    chan = (lanes[:, None] % C == lanes[None, :] % C).astype(jnp.float32)    # same channel
    kernel = functools.partial(_fused_packed_kernel, channels=C, pack=pack)
    out_p = pl.pallas_call(
        kernel,
        out_shape=jax.ShapeDtypeStruct((B, lp, _LANES), x.dtype),
        grid=(B,),
        in_specs=[
            pl.BlockSpec((None, lp, _LANES), lambda b: (b, 0, 0)),
            pl.BlockSpec((1, _LANES), lambda b: (0, 0)),
            pl.BlockSpec((_LANES, _LANES), lambda b: (0, 0)),
            pl.BlockSpec((_LANES, _LANES), lambda b: (0, 0)),
        ],
        out_specs=pl.BlockSpec((None, lp, _LANES), lambda b: (b, 0, 0)),
        compiler_params=_compiler_params(("parallel",), vmem_limit),
    )(xp, gamma_p, tok, chan)
    return out_p.reshape(B, L, C)


def _two_pass_call(x, gamma, tl, vmem_limit):
    B, L, C = x.shape
    n_l = pl.cdiv(L, tl)
    gamma2d = gamma.reshape(1, C)

    # Pass 1: read x once, emit tiny per-tile channel sums of z (no x_hat HBM round-trip).
    # Fully parallel over (B, L-tiles) -> feeds both TensorCores on v7x even for B == 1.
    psums = pl.pallas_call(
        functools.partial(_zsum_kernel, seq_len=L, tile_l=tl),
        out_shape=jax.ShapeDtypeStruct((B, n_l * 8, C), jnp.float32),
        grid=(B, n_l),
        in_specs=[pl.BlockSpec((None, tl, C), lambda b, l: (b, l, 0))],
        out_specs=pl.BlockSpec((None, 8, C), lambda b, l: (b, l, 0)),
        compiler_params=_compiler_params(("parallel", "parallel"), vmem_limit),
    )(x)

    # Tiny (B, n_l*8, C) -> (B, 1, C) reduction + 1/L scale; one fused XLA op.
    zbar = jnp.sum(psums, axis=1, keepdims=True) * (1.0 / L)

    # Pass 2: re-read x, recompute stats, write out.  Also fully parallel.
    return pl.pallas_call(
        _apply_kernel,
        out_shape=jax.ShapeDtypeStruct((B, L, C), x.dtype),
        grid=(B, n_l),
        in_specs=[
            pl.BlockSpec((None, tl, C), lambda b, l: (b, l, 0)),
            pl.BlockSpec((1, C), lambda b, l: (0, 0)),
            pl.BlockSpec((None, 1, C), lambda b, l: (b, 0, 0)),
        ],
        out_specs=pl.BlockSpec((None, tl, C), lambda b, l: (b, l, 0)),
        compiler_params=_compiler_params(("parallel", "parallel"), vmem_limit),
    )(x, gamma2d, zbar)


# ---------------------------------------------------------------------------
# Path selection
# ---------------------------------------------------------------------------
def _pick_l_tile(seq_len, channels, in_bytes, out_bytes, budget_bytes, granule, min_tiles):
    # Per-row per-step VMEM: double-buffered input + double-buffered output + ~one f32 temp
    # (the recompute design needs no full-tile staging scratch).
    bytes_per_row = channels * (2 * in_bytes + 2 * out_bytes + 4)
    tl = (budget_bytes // max(bytes_per_row, 1)) // granule * granule
    tl = min(tl, 2048)                                # HBM roofline saturates around ~512 rows
    tl = min(tl, _round_up(seq_len, granule))
    if min_tiles > 1:
        tl = min(tl, _round_up(pl.cdiv(seq_len, min_tiles), granule))
    tl = max(tl, granule)
    # Prefer a tile that divides seq_len exactly (skips the masked tail) if one lies
    # within 2x of the bandwidth-optimal size.
    for cand in range(tl, max(granule, tl // 2) - 1, -granule):
        if seq_len % cand == 0:
            return cand
    return tl


def my_layernorm(x, gamma, beta, *, vmem_budget_bytes=None):
    """x: (B, L, C); gamma, beta: (C,).  Returns x_hat - mean_L(x_hat), shape (B, L, C).

    beta cancels exactly in x_hat - mean_L(x_hat), so it never enters the kernels.
    """
    del beta
    B, L, C = x.shape
    in_bytes = jnp.dtype(x.dtype).itemsize
    out_bytes = in_bytes
    granule = {4: 8, 2: 16, 1: 32}.get(in_bytes, 8)   # sublane packing granule per dtype

    vmem_limit, default_budget = _vmem_budgets()
    budget = default_budget if vmem_budget_bytes is None else vmem_budget_bytes

    # Fused single-pass estimate: in/out double buffers + ~one f32 temporary (no scratch).
    fused_bytes = L * C * (2 * in_bytes + 2 * out_bytes + 4)

    pack = _LANES // C if (C < _LANES and _LANES % C == 0) else 0
    use_packed = pack >= 2 and (L % pack == 0)

    # On 2-TensorCore chips (v7x) a B == 1 fused grid leaves a core idle: prefer the
    # two-pass path, whose (B, L-tiles) grid exposes >= 2 parallel steps.
    prefer_split = (B == 1) and (L >= 2 * granule) and _is_multi_core_chip()

    if fused_bytes <= budget and not prefer_split:
        if use_packed:
            return _fused_packed_call(x, gamma, pack, vmem_limit)
        return _fused_call(x, gamma, vmem_limit)

    # TODO(synk): if C alone is so large that a single granule-row tile exceeds the scoped
    # VMEM limit, a channel-split (Welford over C tiles) would be needed; not implemented.
    min_tiles = 2 if prefer_split else 1
    tl = _pick_l_tile(L, C, in_bytes, out_bytes, budget, granule, min_tiles)
    return _two_pass_call(x, gamma, tl, vmem_limit)


# ---------------------------------------------------------------------------
# Pure-JAX reference (mirrors the PyTorch module)
# ---------------------------------------------------------------------------
def my_layernorm_ref(x, gamma, beta):
    x = x.astype(jnp.float32)
    mean_c = jnp.mean(x, axis=-1, keepdims=True)
    var_c = jnp.mean((x - mean_c) ** 2, axis=-1, keepdims=True)
    x_hat = (x - mean_c) * jax.lax.rsqrt(var_c + EPS) * gamma + beta
    bias = jnp.mean(x_hat, axis=1, keepdims=True)
    return x_hat - bias


if __name__ == "__main__":
    key = jax.random.PRNGKey(0)

    # (name, (B, L, C), wrapper kwargs) — exercises every code path.
    cases = [
        ("packed    C<128   ", (2, 8, 32), {}),
        ("fused     C=128   ", (2, 8, 128), {}),
        ("two-pass  tiled   ", (2, 256, 128), {"vmem_budget_bytes": 256 * 1024}),
        ("two-pass  ragged L", (2, 200, 128), {"vmem_budget_bytes": 256 * 1024}),
    ]

    for idx, (name, (B, L, C), kw) in enumerate(cases):
        kx, kg, kb = jax.random.split(jax.random.fold_in(key, idx), 3)
        x = jax.random.normal(kx, (B, L, C), dtype=jnp.float32)
        gamma = 1.0 + 0.1 * jax.random.normal(kg, (C,), dtype=jnp.float32)
        beta = 0.1 * jax.random.normal(kb, (C,), dtype=jnp.float32)

        out = jax.block_until_ready(my_layernorm(x, gamma, beta, **kw))
        ref = my_layernorm_ref(x, gamma, beta)

        assert out.shape == (B, L, C), name
        assert jnp.allclose(out, ref, atol=1e-4, rtol=1e-4), f"mismatch vs reference: {name}"

    print("KERNEL_OK")
</pallas_src>

<mosaic_0001>
module attributes {stable_mosaic.version = 11 : i64} {
  func.func @_fused_packed_kernel(%arg0: i32, %arg1: memref<1x2x128xf32, #tpu.memory_space<vmem>>, %arg2: memref<1x128xf32, #tpu.memory_space<vmem>>, %arg3: memref<128x128xf32, #tpu.memory_space<vmem>>, %arg4: memref<128x128xf32, #tpu.memory_space<vmem>>, %arg5: memref<1x2x128xf32, #tpu.memory_space<vmem>>) attributes {dimension_semantics = [#tpu.dimension_semantics<parallel>], iteration_bounds = array<i64: 2>, scalar_prefetch = 0 : i64, scratch_operands = 0 : i64, tpu.core_type = #tpu.core_type<tc>, window_params = [{transform_indices = @transform_0, window_bounds = array<i64: 1, 2, 128>}, {pipeline_mode = #tpu.pipeline_mode<synchronous>, transform_indices = @transform_1, window_bounds = array<i64: 1, 128>}, {pipeline_mode = #tpu.pipeline_mode<synchronous>, transform_indices = @transform_2, window_bounds = array<i64: 128, 128>}, {pipeline_mode = #tpu.pipeline_mode<synchronous>, transform_indices = @transform_3, window_bounds = array<i64: 128, 128>}, {transform_indices = @transform_4, window_bounds = array<i64: 1, 2, 128>}]} {
    %c0 = arith.constant 0 : index
    %c0_0 = arith.constant 0 : index
    %c0_1 = arith.constant 0 : index
    %0 = vector.load %arg1[%c0, %c0_0, %c0_1] : memref<1x2x128xf32, #tpu.memory_space<vmem>>, vector<1x2x128xf32>
    %1 = vector.shape_cast %0 : vector<1x2x128xf32> to vector<2x128xf32>
    %c0_2 = arith.constant 0 : index
    %c0_3 = arith.constant 0 : index
    %2 = vector.load %arg2[%c0_2, %c0_3] : memref<1x128xf32, #tpu.memory_space<vmem>>, vector<1x128xf32>
    %c0_4 = arith.constant 0 : index
    %c0_5 = arith.constant 0 : index
    %3 = vector.load %arg3[%c0_4, %c0_5] : memref<128x128xf32, #tpu.memory_space<vmem>>, vector<128x128xf32>
    %c0_6 = arith.constant 0 : index
    %c0_7 = arith.constant 0 : index
    %4 = vector.load %arg4[%c0_6, %c0_7] : memref<128x128xf32, #tpu.memory_space<vmem>>, vector<128x128xf32>
    %cst = arith.constant dense<0.000000e+00> : vector<2x128xf32>
    %5 = tpu.matmul %1, %3, %cst {dimension_numbers = #tpu.dot_dimension_numbers<[1], [0], [0], [1], [0, 0, 1, 1], [], []>, precision = #tpu.contract_precision<fp32>} : vector<2x128xf32>, vector<128x128xf32>, vector<2x128xf32> -> vector<2x128xf32>
    %cst_8 = arith.constant 3.125000e-02 : f32
    %6 = vector.broadcast %cst_8 : f32 to vector<2x128xf32>
    %7 = arith.mulf %5, %6 : vector<2x128xf32>
    %8 = arith.subf %1, %7 : vector<2x128xf32>
    %9 = arith.mulf %8, %8 : vector<2x128xf32>
    %cst_9 = arith.constant dense<0.000000e+00> : vector<2x128xf32>
    %10 = tpu.matmul %9, %3, %cst_9 {dimension_numbers = #tpu.dot_dimension_numbers<[1], [0], [0], [1], [0, 0, 1, 1], [], []>, precision = #tpu.contract_precision<fp32>} : vector<2x128xf32>, vector<128x128xf32>, vector<2x128xf32> -> vector<2x128xf32>
    %cst_10 = arith.constant 3.125000e-02 : f32
    %11 = vector.broadcast %cst_10 : f32 to vector<2x128xf32>
    %12 = arith.mulf %10, %11 : vector<2x128xf32>
    %cst_11 = arith.constant 9.99999974E-6 : f32
    %13 = vector.broadcast %cst_11 : f32 to vector<2x128xf32>
    %14 = arith.addf %12, %13 : vector<2x128xf32>
    %15 = math.rsqrt %14 : vector<2x128xf32>
    %16 = arith.mulf %8, %15 : vector<2x128xf32>
    %cst_12 = arith.constant dense<0.000000e+00> : vector<128xf32>
    %17 = vector.multi_reduction <add>, %16, %cst_12 [0] : vector<2x128xf32> to vector<128xf32>
    %18 = vector.shape_cast %17 : vector<128xf32> to vector<1x128xf32>
    %cst_13 = arith.constant dense<0.000000e+00> : vector<1x128xf32>
    %19 = tpu.matmul %18, %4, %cst_13 {dimension_numbers = #tpu.dot_dimension_numbers<[1], [0], [0], [1], [0, 0, 1, 1], [], []>, precision = #tpu.contract_precision<fp32>} : vector<1x128xf32>, vector<128x128xf32>, vector<1x128xf32> -> vector<1x128xf32>
    %cst_14 = arith.constant 1.250000e-01 : f32
    %20 = vector.broadcast %cst_14 : f32 to vector<1x128xf32>
    %21 = arith.mulf %19, %20 : vector<1x128xf32>
    %22 = vector.broadcast %21 : vector<1x128xf32> to vector<2x128xf32>
    %23 = arith.subf %16, %22 : vector<2x128xf32>
    %24 = vector.broadcast %2 : vector<1x128xf32> to vector<2x128xf32>
    %25 = arith.mulf %23, %24 : vector<2x128xf32>
    %c0_15 = arith.constant 0 : index
    %c0_16 = arith.constant 0 : index
    %c0_17 = arith.constant 0 : index
    %26 = vector.load %arg5[%c0_15, %c0_16, %c0_17] : memref<1x2x128xf32, #tpu.memory_space<vmem>>, vector<1x2x128xf32>
    %27 = vector.shape_cast %26 : vector<1x2x128xf32> to vector<2x128xf32>
    %28 = vector.shape_cast %25 : vector<2x128xf32> to vector<1x2x128xf32>
    tpu.vector_store %arg5[%c0_15, %c0_16, %c0_17], %28 {strides = array<i32>} : memref<1x2x128xf32, #tpu.memory_space<vmem>>, vector<1x2x128xf32>,
    return
  }
  func.func @transform_0(%arg0: i32) -> (i32, i32, i32) {
    %c0_i32 = arith.constant 0 : i32
    %c0_i32_0 = arith.constant 0 : i32
    %c0_i32_1 = arith.constant 0 : i32
    return %arg0, %c0_i32, %c0_i32_0 : i32, i32, i32
  }
  func.func @transform_1(%arg0: i32) -> (i32, i32) {
    %c0_i32 = arith.constant 0 : i32
    %c0_i32_0 = arith.constant 0 : i32
    %c0_i32_1 = arith.constant 0 : i32
    return %c0_i32, %c0_i32_0 : i32, i32
  }
  func.func @transform_2(%arg0: i32) -> (i32, i32) {
    %c0_i32 = arith.constant 0 : i32
    %c0_i32_0 = arith.constant 0 : i32
    %c0_i32_1 = arith.constant 0 : i32
    return %c0_i32, %c0_i32_0 : i32, i32
  }
  func.func @transform_3(%arg0: i32) -> (i32, i32) {
    %c0_i32 = arith.constant 0 : i32
    %c0_i32_0 = arith.constant 0 : i32
    %c0_i32_1 = arith.constant 0 : i32
    return %c0_i32, %c0_i32_0 : i32, i32
  }
  func.func @transform_4(%arg0: i32) -> (i32, i32, i32) {
    %c0_i32 = arith.constant 0 : i32
    %c0_i32_0 = arith.constant 0 : i32
    %c0_i32_1 = arith.constant 0 : i32
    return %arg0, %c0_i32, %c0_i32_0 : i32, i32, i32
  }
}

</mosaic_0001>

<bundles_post_ra>
// kernel: tpu_custom_call.1
= control target key start
LH: loop header
LB: loop body
LE: loop exit
PB: predicated region body
PF: predicated region fallthrough
CT: control target
= control target key end

     0   :  { %9 = vsyncpa [#allocation3], 0  ;;  %s2580_s0 = inlined_call_operand.hbm [shape: f32[2,2,128], index: 0, kind: input, shape index: {}]   ;;  %s2581_s1 = inlined_call_operand.hbm [shape: f32[1,128], index: 1, kind: input, shape index: {}]   ;;  %s2582_s2 = inlined_call_operand.hbm [shape: f32[128,128], index: 2, kind: input, shape index: {}]   ;;  %s2583_s3 = inlined_call_operand.hbm [shape: f32[128,128], index: 3, kind: input, shape index: {}]   ;;  %s2584_s4 = inlined_call_operand.hbm [shape: f32[2,2,128], index: 4, kind: output, shape index: {}]  }
   0x1   :  { %11 = vsyncpa [#allocation3 + $0x1], 0 }
   0x2   :  { %12 = vsyncpa [#allocation6], 0 }
   0x3   :  { %13 = vsyncpa [#allocation9], 0 }
   0x4   :  { %14 = vsyncpa [#allocation4], 0 }
   0x5   :  { %16 = vsyncpa [#allocation4 + $0x1], 0  ;;  %s1793_s15 = smov 0   ;;  %s1795_s16 = smov 0  }
   0x6   :  { %s1797_s17 = smov 0   ;;  %s1799_s18 = smov 0  }
   0x7 LB: > { %s1814_s19 = sadd.s32 4294967295, %s1761_s18   ;;  %s1467_s20 = sadd.s32 4294967294, %s1761_s18   ;;  %s1761_s18 = sphi %s1799_s18, %s2619_s18   ;;  %s1757_s17 = sphi %s1797_s17, %s2618_s17   ;;  %s1753_s16 = sphi %s1795_s16, %s2617_s16   ;;  %s1749_s15 = sphi %s1793_s15, %s2616_s15  }
   0x8   : > { %p42_p0 = scmp.ne.s32.totalorder %s1753_s16, %s1749_s15  ;;  %p43_p1 = scmp.eq.s32.totalorder %s1814_s19, 0 }
   0x9   : > { %p129_p2 = scmp.eq.s32.totalorder %s1814_s19, 1  ;;  %p135_p3 = scmp.eq.s32.totalorder %s1467_s20, 1 }
   0xa   : > { %p1823_p4 = por %p43_p1, %p42_p0  ;;  %p1468_p5 = scmp.ge.s32.totalorder %s1761_s18, 1 }
   0xb   : > { %p1828_p6 = por %p135_p3, %p42_p0  ;;  %p142_p7 = scmp.lt.s32.totalorder %s1761_s18, 3 }
   0xc   : > { %s154_s25 = sshll.u32 %s2581_s1, 4  ;;  %s1763_s27 = smov [#allocation5]   ;;  %s155_s25 = int_to_ptr.hbm [resolvable:$true] %s154_s25 }
   0xd   : > { %p1836_p8 = pnand %p1468_p5, %p142_p7  ;;  %s156_s28 = sshll.u32 %s1763_s27, 4  ;;  %s157_s28 = int_to_ptr.vmem [resolvable:$true] %s156_s28 }
   0xe   : > { %s165_s5 = sshll.u32 %s2582_s2, 4  ;;  %s1764_s7 = smov [#allocation7]   ;;  %s166_s5 = int_to_ptr.hbm [resolvable:$true] %s165_s5 }
   0xf   : > { %p1501_p10 = pneg %p1836_p8  ;;  %s167_s8 = sshll.u32 %s1764_s7, 4  ;;  %s168_s8 = int_to_ptr.vmem [resolvable:$true] %s167_s8 }
  0x10   : > { %s1765_s9 = smov 128   ;;  %s1766_s10 = smov 8  }
  0x11   : > { %p1848_p11 = pnand %p1501_p10, %p43_p1  ;;  %s179_s13 = sshll.u32 %s2583_s3, 4  ;;  %s180_s13 = int_to_ptr.hbm [resolvable:$true] %s179_s13 }
  0x12   : > { %s1767_s14 = smov [#allocation8]   ;;  %s1862_s23 = sadd.s32 1, %s1761_s18  }
  0x13   : > { %1504 = dma.hbm_to_vmem [thread:$0]  (!%p1848_p11), %s155_s25, 16, %s157_s28, [#allocation6]  }
  0x14   : > { %1507 = dma.hbm_to_vmem [thread:$0]  (!%p1848_p11), %s166_s5, 2048, %s168_s8, [#allocation6], %s1765_s9, %s1765_s9, %s1766_s10  }
  0x15   : > { %s181_s20 = sshll.u32 %s1767_s14, 4  ;;  %s26_s24 = ssub.s32 %s1761_s18, %s1862_s23  ;;  %s182_s20 = int_to_ptr.vmem [resolvable:$true] %s181_s20 }
  0x16   : > { %1510 = dma.hbm_to_vmem [thread:$0]  (!%p1848_p11), %s180_s13, 2048, %s182_s20, [#allocation9], %s1765_s9, %s1765_s9, %s1766_s10  }
  0x17   : > { %s29_s25 = sadd.s32 1, %s1757_s17  ;;  %p27_p12 = scmp.eq.s32.totalorder %s26_s24, 0 }
  0x18   : > { %p36_p13 = scmp.ne.s32.totalorder %s1757_s17, %s1753_s16  ;;  %p37_p0 = scmp.eq.s32.totalorder %s1761_s18, 0 }
  0x19   : > { %s1871_s27 = scalar_select %p27_p12, %s1757_s17, %s29_s25  }
  0x1a   : > { %p1875_p3 = por %p129_p2, %p36_p13  ;;  %p1522_p5 = scmp.lt.s32.totalorder %s1761_s18, 2 }
  0x1b   : > { %s195_s29 = sand.u32 1, %s1757_s17   ;;  %s1474_s30 = sshll.u32 %s1761_s18, 1 }
  0x1c   : > { %p38_p7 = por %p37_p0, %p36_p13  ;;  %s1473_s5 = sshll.u32 %s195_s29, 1 }
  0x1d   : > { %s203_s8 = scalar_lea.hbm %s2580_s0, %s1474_s30  ;;  %s199_s10 = scalar_lea.vmem [#allocation2], %s1473_s5 }
  0x1e   : > { %s205_s9 = sshll.u32 %s203_s8, 4  ;;  %s207_s11 = sshll.u32 %s199_s10, 4  ;;  %s206_s9 = int_to_ptr.hbm [resolvable:$true] %s205_s9  ;;  %s208_s11 = int_to_ptr.vmem [resolvable:$true] %s207_s11 }
  0x1f   : > { %p1885_p10 = pnand %p1522_p5, %p38_p7  ;;  %s196_s13 = scalar_lea.sflag [#allocation3], %s195_s29 }
  0x20   : > { %s1657_s14 = sshra.s32 %s206_s9, 4  ;;  %s1664_s30 = scalar_lea.hbm %s2580_s0, 4  ;;  %s1658_s14 = int_to_ptr.hbm [resolvable:$true] %s1657_s14 }
  0x21   : > { %s1659_s20 = scalar_lea.hbm %s1658_s14, 2  ;;  %p1661_p11 = pneg %p1885_p10 }
  0x22   : > { %p1660_p2 = scmp.ne.s32.totalorder %s1658_s14, %s1659_s20  ;;  %p1665_p0 = scmp.lt.s32.totalorder %s1658_s14, %s2580_s0 }
  0x23   : > { %p1666_p5 = scmp.lt.s32.totalorder %s1664_s30, %s1659_s20 }
  0x24   : > { %p1662_p12 = pnand %p1661_p11, %p1660_p2 }
  0x25   : > { %p1667_p7 = por %p1666_p5, %p1665_p0 }
  0x26   : > { %p1663_p13 = pneg %p1662_p12 }
  0x28   : > { %p1668_p9 = pnand %p1667_p7, %p1663_p13 }
  0x2a   : > { %1671 = shalt.err (!%p1668_p9)
}
  0x2b   : > { %1514 = dma.hbm_to_vmem [thread:$0]  (!%p1885_p10), %s206_s9, 32, %s208_s11, %s196_s13  }
  0x2c   : > { %216 = sbr.rel (%p1836_p8) target bundleno = 615 (0x267), region = 36 }
  0x31   : > { %s1902_s29 = sand.u32 1, %s1753_s16  }
  0x32   : > { %s1476_s7 = sshll.u32 %s1902_s29, 1  ;;  %s219_s8 = scalar_lea.sflag [#allocation3], %s1902_s29 }
  0x33   : > { %s1908_s10 = scalar_lea.vmem [#allocation2], %s1476_s7 }
  0x34   : > { %1732 = dma.done.wait (%p1823_p4), %s219_s8, 32  }
  0x35   : > { %1734 = vsyncadd (%p1823_p4), %s219_s8, 4294967264 }
  0x36   : > { %1736 = dma.done.wait (%p43_p1), [#allocation6], 2064  }
  0x37   : > { %1738 = vsyncadd (%p43_p1), [#allocation6], 4294965232 }
  0x38   : > { %1740 = dma.done.wait (%p43_p1), [#allocation9], 2048  }
  0x39   : > { %1742 = vsyncadd (%p43_p1), [#allocation9], 4294965248  ;;  %v280_v0 = vld [vmem:[#allocation7 + $0x78] sm:$0xff]  ;;  %v279_v1 = vld [vmem:[#allocation7 + $0x70] sm:$0xff]  ;;  %vm995_vm3 = vcmask 1041408   ;;  %s1482_s21 = sshll.u32 %s1814_s19, 1 }
  0x3a   : > { %v278_v2 = vld [vmem:[#allocation7 + $0x68] sm:$0xff]  ;;  %v1922_v3 = vand.u32 4294901760, %v280_v0  ;;  %v1924_v4 = vand.u32 4294901760, %v279_v1  ;;  %v277_v6 = vld [vmem:[#allocation7 + $0x60] sm:$0xff]  ;;  %v276_v7 = vld [vmem:[#allocation7 + $0x58] sm:$0xff]  ;;  %s1363_s11 = scalar_lea.hbm %s2584_s4, %s1482_s21  ;;  %s262_s12 = scalar_lea.vmem [#allocation10], %s1476_s7 }
  0x3b   : > { %v1926_v5 = vand.u32 4294901760, %v278_v2  ;;  %v275_v8 = vld [vmem:[#allocation7 + $0x50] sm:$0xff]  ;;  %v1928_v9 = vand.u32 4294901760, %v277_v6  ;;  %v1930_v10 = vand.u32 4294901760, %v276_v7  ;;  %v274_v12 = vld [vmem:[#allocation7 + $0x48] sm:$0xff]  ;;  %v273_v13 = vld [vmem:[#allocation7 + $0x40] sm:$0xff] }
  0x3c   : > { %v1932_v11 = vand.u32 4294901760, %v275_v8  ;;  %298 = vmatpush.msra.mxu0 %v1922_v3  ;;  %v1936_v14 = vsub.f32 %v280_v0, %v1922_v3  ;;  %v1939_v15 = vsub.f32 %v279_v1, %v1924_v4  ;;  %v1944_v17 = vand.u32 4294901760, %v274_v12  ;;  %v272_v18 = vld [vmem:[#allocation7 + $0x38] sm:$0xff]  ;;  %494 = vmatpush.msra.mxu3 %v1922_v3  ;;  %v271_v26 = vld [vmem:[#allocation7 + $0x30] sm:$0xff]  ;;  %v270_v36 = vld [vmem:[#allocation7 + $0x28] sm:$0xff]  ;;  %s1365_s13 = sshll.u32 %s262_s12, 4  ;;  %s1366_s13 = int_to_ptr.vmem [resolvable:$true] %s1365_s13 }
  0x3d   : > { %v1942_v16 = vsub.f32 %v278_v2, %v1926_v5  ;;  %v1948_v19 = vsub.f32 %v277_v6, %v1928_v9  ;;  %v1951_v20 = vsub.f32 %v276_v7, %v1930_v10  ;;  %v1966_v25 = vand.u32 4294901760, %v273_v13  ;;  %v269_v42 = vld [vmem:[#allocation7 + $0x20] sm:$0xff]  ;;  %v268_v47 = vld [vmem:[#allocation7 + $0x18] sm:$0xff]  ;;  %v267_v55 = vld [vmem:[#allocation7 + $0x10] sm:$0xff]  ;;  %s1367_s14 = sshll.u32 %s1363_s11, 4  ;;  %s1353_s20 = scalar_lea.sflag [#allocation4], %s1902_s29  ;;  %s1368_s14 = int_to_ptr.hbm [resolvable:$true] %s1367_s14 }
  0x3e   : > { %v1954_v21 = vsub.f32 %v275_v8, %v1932_v11  ;;  %300 = vmatpush.msra.mxu0 %v1924_v4  ;;  %v1958_v22 = vand.u32 4294901760, %v1936_v14  ;;  %v1961_v23 = vand.u32 4294901760, %v1939_v15  ;;  %441 = vmatpush.msra.mxu2 %v1936_v14  ;;  %v1972_v28 = vand.u32 4294901760, %v272_v18  ;;  %v266_v60 = vld [vmem:[#allocation7 + $0x8] sm:$0xff]  ;;  %v265_v1 = vld [vmem:[#allocation7] sm:$0xff]  ;;  %s1701_s19 = sshra.s32 %s1368_s14, 4  ;;  %s1702_s19 = int_to_ptr.hbm [resolvable:$true] %s1701_s19 }
  0x3f   : > { %v1964_v24 = vand.u32 4294901760, %v1942_v16  ;;  %v1970_v27 = vand.u32 4294901760, %v1948_v19  ;;  %v1975_v29 = vsub.f32 %v274_v12, %v1944_v17  ;;  %496 = vmatpush.msra.mxu3 %v1924_v4  ;;  %v1986_v33 = vand.u32 4294901760, %v1951_v20  ;;  %v2077_v7 = vld [vmem:[%s1908_s10] sm:$0x3]  ;;  %s1703_s24 = scalar_lea.hbm %s1702_s19, 2  ;;  %p1708_p9 = scmp.lt.s32.totalorder %s1702_s19, %s2584_s4 }
  0x40   : > { %302 = vmatpush.msra.mxu0 %v1926_v5  ;;  %v341_v30 = vsub.f32 %v1936_v14, %v1958_v22  ;;  %v347_v31 = vsub.f32 %v1939_v15, %v1961_v23  ;;  %444 = vmatpush.msra.mxu2 %v1939_v15  ;;  %v1990_v34 = vand.u32 4294901760, %v1954_v21  ;;  %v1992_v35 = vand.u32 4294901760, %v271_v26  ;;  %2605 = vst [vmem:[#allocation21_spill] sm:$0xff] %v2077_v7  ;;  %p1704_p1 = scmp.ne.s32.totalorder %s1702_s19, %s1703_s24  ;;  %s1707_s5 = scalar_lea.hbm %s2584_s4, 4 }
  0x41   : > { %v353_v32 = vsub.f32 %v1942_v16, %v1964_v24  ;;  %498 = vmatpush.msra.mxu3 %v1926_v5  ;;  %v359_v39 = vsub.f32 %v1948_v19, %v1970_v27  ;;  %v2003_v40 = vsub.f32 %v273_v13, %v1966_v25  ;;  %v2007_v41 = vand.u32 4294901760, %v1975_v29  ;;  %p1709_p10 = scmp.lt.s32.totalorder %s1707_s5, %s1703_s24 }
  0x42   : > { %v1995_v37 = vand.u32 4294901760, %v341_v30  ;;  %304 = vmatpush.msra.mxu0 %v1928_v9  ;;  %v1998_v38 = vand.u32 4294901760, %v347_v31  ;;  %447 = vmatpush.msra.mxu2 %v1942_v16  ;;  %v365_v44 = vsub.f32 %v1951_v20, %v1986_v33  ;;  %v2016_v45 = vand.u32 4294901760, %v270_v36  ;;  %p1705_p4 = pnand %p1704_p1, %p1875_p3 }
  0x43   : > { %2599 = vst [vmem:[#allocation15_spill] sm:$0xff] %v2003_v40  ;;  %500 = vmatpush.msra.mxu3 %v1928_v9  ;;  %v2012_v43 = vand.u32 4294901760, %v353_v32  ;;  %v2019_v46 = vsub.f32 %v272_v18, %v1972_v28  ;;  %v371_v48 = vsub.f32 %v1954_v21, %v1990_v34  ;;  %v2027_v49 = vand.u32 4294901760, %v359_v39  ;;  %p1710_p2 = por %p1709_p10, %p1708_p9 }
  0x44   : > { %343 = vmatpush.msra.mxu1 %v1995_v37  ;;  %306 = vmatpush.msra.mxu0 %v1930_v10  ;;  %v2030_v50 = vand.u32 4294901760, %v2003_v40  ;;  %v2032_v51 = vand.u32 4294901760, %v269_v42  ;;  %v2035_v52 = vsub.f32 %v271_v26, %v1992_v35  ;;  %v377_v53 = vsub.f32 %v1975_v29, %v2007_v41  ;;  %p1706_p8 = pneg %p1705_p4 }
  0x45   : > { %2600 = vst [vmem:[#allocation16_spill] sm:$0xff] %v2019_v46  ;;  %450 = vmatpush.msra.mxu2 %v1948_v19  ;;  %502 = vmatpush.msra.mxu3 %v1930_v10  ;;  %v2039_v54 = vand.u32 4294901760, %v268_v47  ;;  %v2045_v56 = vand.u32 4294901760, %v365_v44  ;;  %v2048_v57 = vand.u32 4294901760, %v2019_v46  ;;  %v2051_v58 = vsub.f32 %v270_v36, %v2016_v45 }
  0x46   : > { %349 = vmatpush.msra.mxu1 %v1998_v38  ;;  %308 = vmatpush.msra.mxu0 %v1932_v11  ;;  %2601 = vst [vmem:[#allocation17_spill] sm:$0xff] %v2035_v52  ;;  %v2053_v59 = vand.u32 4294901760, %v371_v48  ;;  %v383_v61 = vsub.f32 %v2003_v40, %v2030_v50  ;;  %v2062_v62 = vand.u32 4294901760, %v2035_v52  ;;  %v2064_v63 = vand.u32 4294901760, %v267_v55  ;;  %p1711_p11 = pnand %p1710_p2, %p1706_p8 }
  0x47   : > { %453 = vmatpush.msra.mxu2 %v1951_v20  ;;  %504 = vmatpush.msra.mxu3 %v1932_v11  ;;  %2602 = vst [vmem:[#allocation18_spill] sm:$0xff] %v2051_v58  ;;  %v2067_v0 = vsub.f32 %v269_v42, %v2032_v51  ;;  %v2069_v2 = vand.u32 4294901760, %v377_v53  ;;  %v2072_v6 = vsub.f32 %v268_v47, %v2039_v54  ;;  %v2084_v12 = vand.u32 4294901760, %v2051_v58 }
  0x48   : > { %355 = vmatpush.msra.mxu1 %v2012_v43  ;;  %310 = vmatpush.msra.mxu0 %v1944_v17  ;;  %v389_v8 = vsub.f32 %v2019_v46, %v2048_v57  ;;  %v2086_v13 = vand.u32 4294901760, %v266_v60  ;;  %v2089_v18 = vand.u32 4294901760, %v2077_v7  ;;  %v2091_v26 = vand.u32 4294901760, %v265_v1 }
  0x49   : > { %456 = vmatpush.msra.mxu2 %v1954_v21  ;;  %506 = vmatpush.msra.mxu3 %v1944_v17  ;;  %2603 = vst [vmem:[#allocation19_spill] sm:$0xff] %v2067_v0  ;;  %v2097_v30 = vand.u32 4294901760, %v383_v61  ;;  %v395_v31 = vsub.f32 %v2035_v52, %v2062_v62  ;;  %v2102_v32 = vand.u32 4294901760, %v2067_v0  ;;  %v2105_v36 = vsub.f32 %v267_v55, %v2064_v63 }
  0x4a   : > { %361 = vmatpush.msra.mxu1 %v2027_v49  ;;  %312 = vmatpush.msra.mxu0 %v1966_v25  ;;  %2604 = vst [vmem:[#allocation20_spill] sm:$0xff] %v2072_v6  ;;  %v2108_v39 = vand.u32 4294901760, %v2072_v6  ;;  %v2114_v42 = vand.u32 4294901760, %v389_v8  ;;  %v401_v44 = vsub.f32 %v2051_v58, %v2084_v12  ;;  %v2119_v47 = vsub.f32 %v266_v60, %v2086_v13 }
  0x4b   : > { %459 = vmatpush.msra.mxu2 %v1975_v29  ;;  %508 = vmatpush.msra.mxu3 %v1966_v25  ;;  %2606 = vst [vmem:[#allocation22_spill] sm:$0xff] %v2105_v36  ;;  %v330_v48 = vsub.f32 %v2077_v7, %v2089_v18  ;;  %v2127_v53 = vand.u32 4294901760, %v395_v31  ;;  %v407_v55 = vsub.f32 %v2067_v0, %v2102_v32  ;;  %v2132_v61 = vand.u32 4294901760, %v2105_v36 }
  0x4c   : > { %367 = vmatpush.msra.mxu1 %v2045_v56  ;;  %314 = vmatpush.msra.mxu0 %v1972_v28  ;;  %v2135_v60 = vsub.f32 %v265_v1, %v2091_v26  ;;  %v2141_v8 = vand.u32 4294901760, %v401_v44  ;;  %v413_v31 = vsub.f32 %v2072_v6, %v2108_v39  ;;  %v2146_v7 = vand.u32 4294901760, %v2119_v47 }
  0x4d   : > { %462 = vmatpush.msra.mxu2 %v2003_v40  ;;  %510 = vmatpush.msra.mxu3 %v1972_v28  ;;  %v2152_v1 = vand.u32 4294901760, %v407_v55  ;;  %v419_v44 = vsub.f32 %v2105_v36, %v2132_v61 }
  0x4e   : > { %373 = vmatpush.msra.mxu1 %v2053_v59  ;;  %316 = vmatpush.msra.mxu0 %v1992_v35  ;;  %v425_v55 = vsub.f32 %v2119_v47, %v2146_v7 }
  0x4f   : > { %465 = vmatpush.msra.mxu2 %v2019_v46  ;;  %512 = vmatpush.msra.mxu3 %v1992_v35 }
  0x50   : > { %379 = vmatpush.msra.mxu1 %v2069_v2  ;;  %318 = vmatpush.msra.mxu0 %v2016_v45 }
  0x51   : > { %468 = vmatpush.msra.mxu2 %v2035_v52  ;;  %514 = vmatpush.msra.mxu3 %v2016_v45  ;;  %v331_v52 = vand.u32 4294901760, %v330_v48 }
  0x52   : > { %385 = vmatpush.msra.mxu1 %v2097_v30  ;;  %320 = vmatpush.msra.mxu0 %v2032_v51 }
  0x53   : > { %471 = vmatpush.msra.mxu2 %v2051_v58  ;;  %516 = vmatpush.msra.mxu3 %v2032_v51  ;;  %v2157_v58 = vand.u32 4294901760, %v2135_v60  ;;  %v332_v46 = vsub.f32 %v330_v48, %v331_v52 }
  0x54   : > { %391 = vmatpush.msra.mxu1 %v2114_v42  ;;  %322 = vmatpush.msra.mxu0 %v2039_v54 }
  0x55   : > { %474 = vmatpush.msra.mxu2 %v2067_v0  ;;  %518 = vmatpush.msra.mxu3 %v2039_v54  ;;  %v2163_v0 = vand.u32 4294901760, %v413_v31  ;;  %v431_v40 = vsub.f32 %v2135_v60, %v2157_v58  ;;  %v2178_v31 = vand.u32 4294901760, %v425_v55 }
  0x56   : > { %397 = vmatpush.msra.mxu1 %v2127_v53  ;;  %324 = vmatpush.msra.mxu0 %v2064_v63 }
  0x57   : > { %477 = vmatpush.msra.mxu2 %v2072_v6  ;;  %520 = vmatpush.msra.mxu3 %v2064_v63  ;;  %v2171_v6 = vand.u32 4294901760, %v419_v44  ;;  %v2184_v44 = vand.u32 4294901760, %v431_v40 }
  0x58   : > { %403 = vmatpush.msra.mxu1 %v2141_v8  ;;  %326 = vmatpush.msra.mxu0 %v2086_v13 }
  0x59   : > { %480 = vmatpush.msra.mxu2 %v2105_v36  ;;  %522 = vmatpush.msra.mxu3 %v2086_v13  ;;  %v333_v36 = vand.u32 4294901760, %v332_v46  ;;  %v295_v46 = vld [vmem:[#allocation8 + $0x70] sm:$0xff] }
  0x5a   : > { %409 = vmatpush.msra.mxu1 %v2152_v1  ;;  %328 = vmatpush.msra.mxu0 %v2091_v26 }
  0x5b   : > { %483 = vmatpush.msra.mxu2 %v2119_v47  ;;  %524 = vmatpush.msra.mxu3 %v2091_v26 }
  0x5c   : > { %535 = vmatpush.msrb.mxu0 %v1958_v22  ;;  %415 = vmatpush.msra.mxu1 %v2163_v0 }
  0x5d   : > { %486 = vmatpush.msra.mxu2 %v2135_v60  ;;  %528 = vmatmul.f32.vlgmr.msra.gmra.mxu3 %v331_v52 }
  0x5e   : > { %539 = vmatpush.msrb.mxu0 %v1961_v23  ;;  %421 = vmatpush.msra.mxu1 %v2171_v6 }
  0x5f   : > { %489 = vmatmul.f32.vlgmr.msra.gmra.mxu2 %v330_v48  ;;  %334 = vmatmul.f32.vlgmr.msra.gmra.mxu0 %v333_v36 }
  0x60   : > { %543 = vmatpush.msrb.mxu0 %v1964_v24  ;;  %427 = vmatpush.msra.mxu1 %v2178_v31 }
  0x61   : > { %687 = vmatpush.msrb.mxu3 %v1995_v37  ;;  %642 = vmatpush.msrb.mxu2 %v1922_v3 }
  0x62   : > { %547 = vmatpush.msrb.mxu0 %v1970_v27  ;;  %433 = vmatpush.msra.mxu1 %v2184_v44 }
  0x63   : > { %435 = vmatmul.f32.vlgmr.msra.gmra.mxu1 %v2089_v18  ;;  %693 = vmatpush.msrb.mxu3 %v1998_v38 }
  0x64   : > { %602 = vmatpush.msrb.mxu1 %v1922_v3  ;;  %551 = vmatpush.msrb.mxu0 %v1986_v33 }
  0x65   : > { %699 = vmatpush.msrb.mxu3 %v2012_v43  ;;  %644 = vmatpush.msrb.mxu2 %v1924_v4  ;;  %v296_v43 = vld [vmem:[#allocation8 + $0x78] sm:$0xff] }
  0x66   : > { %604 = vmatpush.msrb.mxu1 %v1924_v4  ;;  %555 = vmatpush.msrb.mxu0 %v1990_v34 }
  0x67   : > { %705 = vmatpush.msrb.mxu3 %v2027_v49  ;;  %646 = vmatpush.msrb.mxu2 %v1926_v5 }
  0x68   : > { %606 = vmatpush.msrb.mxu1 %v1926_v5  ;;  %559 = vmatpush.msrb.mxu0 %v2007_v41 }
  0x69   : > { %711 = vmatpush.msrb.mxu3 %v2045_v56  ;;  %648 = vmatpush.msrb.mxu2 %v1928_v9 }
  0x6a   : > { %608 = vmatpush.msrb.mxu1 %v1928_v9  ;;  %563 = vmatpush.msrb.mxu0 %v2030_v50 }
  0x6b   : > { %717 = vmatpush.msrb.mxu3 %v2053_v59  ;;  %650 = vmatpush.msrb.mxu2 %v1930_v10 }
  0x6c   : > { %610 = vmatpush.msrb.mxu1 %v1930_v10  ;;  %567 = vmatpush.msrb.mxu0 %v2048_v57 }
  0x6d   : > { %723 = vmatpush.msrb.mxu3 %v2069_v2  ;;  %652 = vmatpush.msrb.mxu2 %v1932_v11 }
  0x6e   : > { %612 = vmatpush.msrb.mxu1 %v1932_v11  ;;  %571 = vmatpush.msrb.mxu0 %v2062_v62 }
  0x6f   : > { %729 = vmatpush.msrb.mxu3 %v2097_v30  ;;  %654 = vmatpush.msrb.mxu2 %v1944_v17 }
  0x70   : > { %614 = vmatpush.msrb.mxu1 %v1944_v17  ;;  %575 = vmatpush.msrb.mxu0 %v2084_v12 }
  0x71   : > { %735 = vmatpush.msrb.mxu3 %v2114_v42  ;;  %656 = vmatpush.msrb.mxu2 %v1966_v25  ;;  %v290_v42 = vld [vmem:[#allocation8 + $0x48] sm:$0xff] }
  0x72   : > { %616 = vmatpush.msrb.mxu1 %v1966_v25  ;;  %579 = vmatpush.msrb.mxu0 %v2102_v32 }
  0x73   : > { %741 = vmatpush.msrb.mxu3 %v2127_v53  ;;  %658 = vmatpush.msrb.mxu2 %v1972_v28 }
  0x74   : > { %618 = vmatpush.msrb.mxu1 %v1972_v28  ;;  %583 = vmatpush.msrb.mxu0 %v2108_v39 }
  0x75   : > { %747 = vmatpush.msrb.mxu3 %v2141_v8  ;;  %660 = vmatpush.msrb.mxu2 %v1992_v35  ;;  %v289_v8 = vld [vmem:[#allocation8 + $0x40] sm:$0xff] }
  0x76   : > { %620 = vmatpush.msrb.mxu1 %v1992_v35  ;;  %587 = vmatpush.msrb.mxu0 %v2132_v61 }
  0x77   : > { %753 = vmatpush.msrb.mxu3 %v2152_v1  ;;  %662 = vmatpush.msrb.mxu2 %v2016_v45 }
  0x78   : > { %622 = vmatpush.msrb.mxu1 %v2016_v45  ;;  %591 = vmatpush.msrb.mxu0 %v2146_v7 }
  0x79   : > { %759 = vmatpush.msrb.mxu3 %v2163_v0  ;;  %664 = vmatpush.msrb.mxu2 %v2032_v51  ;;  %v292_v0 = vld [vmem:[#allocation8 + $0x58] sm:$0xff] }
  0x7a   : > { %624 = vmatpush.msrb.mxu1 %v2032_v51  ;;  %595 = vmatpush.msrb.mxu0 %v2157_v58 }
  0x7b   : > { %597 = vmatmul.f32.vlgmr.msrb.gmra.mxu0 %v2089_v18  ;;  %765 = vmatpush.msrb.mxu3 %v2171_v6 }
  0x7c   : > { %626 = vmatpush.msrb.mxu1 %v2039_v54  ;;  %785 = vmatpush.msra.mxu0 %v1936_v14  ;;  %v2613_v14 = vld [vmem:[#allocation22_spill] sm:$0xff] }
  0x7d   : > { %771 = vmatpush.msrb.mxu3 %v2178_v31  ;;  %666 = vmatpush.msrb.mxu2 %v2039_v54 }
  0x7e   : > { %628 = vmatpush.msrb.mxu1 %v2064_v63  ;;  %788 = vmatpush.msra.mxu0 %v1939_v15 }
  0x7f   : > { %777 = vmatpush.msrb.mxu3 %v2184_v44  ;;  %668 = vmatpush.msrb.mxu2 %v2064_v63  ;;  %v2391_v44 = vand.u32 4294901760, %v289_v8 }
  0x80   : > { %630 = vmatpush.msrb.mxu1 %v2086_v13  ;;  %791 = vmatpush.msra.mxu0 %v1942_v16 }
  0x81   : > { %946 = vmatpush.msra.mxu3 %v1922_v3  ;;  %670 = vmatpush.msrb.mxu2 %v2086_v13 }
  0x82   : > { %632 = vmatpush.msrb.mxu1 %v2091_v26  ;;  %794 = vmatpush.msra.mxu0 %v1948_v19 }
  0x83   : > { %634 = vmatmul.f32.vlgmr.msrb.gmra.mxu1 %v2089_v18  ;;  %948 = vmatpush.msra.mxu3 %v1924_v4  ;;  %v291_v18 = vld [vmem:[#allocation8 + $0x50] sm:$0xff] }
  0x84   : > { %838 = vmatpush.msra.mxu1 %v1922_v3  ;;  %797 = vmatpush.msra.mxu0 %v1951_v20  ;;  %v2607_v3 = vld [vmem:[#allocation15_spill] sm:$0xff]  ;;  %v2368_v36 = vand.u32 4294901760, %v291_v18 }
  0x85   : > { %950 = vmatpush.msra.mxu3 %v1926_v5  ;;  %672 = vmatpush.msrb.mxu2 %v2091_v26 }
  0x86   : > { %840 = vmatpush.msra.mxu1 %v1924_v4  ;;  %800 = vmatpush.msra.mxu0 %v1954_v21  ;;  %v2608_v4 = vld [vmem:[#allocation16_spill] sm:$0xff]  ;;  %v2380_v53 = vsub.f32 %v291_v18, %v2368_v36 }
  0x87   : > { %952 = vmatpush.msra.mxu3 %v1928_v9  ;;  %879 = vmatpush.msra.mxu2 %v1958_v22 }
  0x88   : > { %842 = vmatpush.msra.mxu1 %v1926_v5  ;;  %803 = vmatpush.msra.mxu0 %v1975_v29  ;;  %v2609_v5 = vld [vmem:[#allocation17_spill] sm:$0xff]  ;;  %v1076_v55 = vand.u32 4294901760, %v2380_v53 }
  0x89   : > { %954 = vmatpush.msra.mxu3 %v1930_v10  ;;  %883 = vmatpush.msra.mxu2 %v1961_v23  ;;  %v2614_v29 = vld [vmem:[#allocation21_spill] sm:$0xff] }
  0x8a   : > { %844 = vmatpush.msra.mxu1 %v1928_v9  ;;  %806 = vmatpush.msra.mxu0 %v2607_v3  ;;  %v2610_v9 = vld [vmem:[#allocation18_spill] sm:$0xff] }
  0x8b   : > { %956 = vmatpush.msra.mxu3 %v1932_v11  ;;  %887 = vmatpush.msra.mxu2 %v1964_v24 }
  0x8c   : > { %846 = vmatpush.msra.mxu1 %v1930_v10  ;;  %809 = vmatpush.msra.mxu0 %v2608_v4  ;;  %v2611_v10 = vld [vmem:[#allocation19_spill] sm:$0xff]  ;;  %v288_v4 = vld [vmem:[#allocation8 + $0x38] sm:$0xff] }
  0x8d   : > { %958 = vmatpush.msra.mxu3 %v1944_v17  ;;  %891 = vmatpush.msra.mxu2 %v1970_v27 }
  0x8e   : > { %848 = vmatpush.msra.mxu1 %v1932_v11  ;;  %812 = vmatpush.msra.mxu0 %v2609_v5  ;;  %v2612_v11 = vld [vmem:[#allocation20_spill] sm:$0xff]  ;;  %v1077_v5 = vsub.f32 %v2380_v53, %v1076_v55 }
  0x8f   : > { %960 = vmatpush.msra.mxu3 %v1966_v25  ;;  %895 = vmatpush.msra.mxu2 %v1986_v33 }
  0x90   : > { %850 = vmatpush.msra.mxu1 %v1944_v17  ;;  %815 = vmatpush.msra.mxu0 %v2610_v9 }
  0x91   : > { %962 = vmatpush.msra.mxu3 %v1972_v28  ;;  %899 = vmatpush.msra.mxu2 %v1990_v34 }
  0x92   : > { %852 = vmatpush.msra.mxu1 %v1966_v25  ;;  %818 = vmatpush.msra.mxu0 %v2611_v10  ;;  %v2404_v10 = vsub.f32 %v289_v8, %v2391_v44 }
  0x93   : > { %964 = vmatpush.msra.mxu3 %v1992_v35  ;;  %903 = vmatpush.msra.mxu2 %v2007_v41 }
  0x94   : > { %854 = vmatpush.msra.mxu1 %v1972_v28  ;;  %821 = vmatpush.msra.mxu0 %v2612_v11  ;;  %v2406_v11 = vand.u32 4294901760, %v288_v4 }
  0x95   : > { %966 = vmatpush.msra.mxu3 %v2016_v45  ;;  %907 = vmatpush.msra.mxu2 %v2030_v50  ;;  %v2327_v50 = vand.u32 4294901760, %v295_v46 }
  0x96   : > { %856 = vmatpush.msra.mxu1 %v1992_v35  ;;  %824 = vmatpush.msra.mxu0 %v2613_v14 }
  0x97   : > { %968 = vmatpush.msra.mxu3 %v2032_v51  ;;  %911 = vmatpush.msra.mxu2 %v2048_v57  ;;  %v293_v57 = vld [vmem:[#allocation8 + $0x60] sm:$0xff] }
  0x98   : > { %858 = vmatpush.msra.mxu1 %v2016_v45  ;;  %827 = vmatpush.msra.mxu0 %v2119_v47  ;;  %v2322_v45 = vand.u32 4294901760, %v296_v43 }
  0x99   : > { %970 = vmatpush.msra.mxu3 %v2039_v54  ;;  %915 = vmatpush.msra.mxu2 %v2062_v62 }
  0x9a   : > { %860 = vmatpush.msra.mxu1 %v2032_v51  ;;  %830 = vmatpush.msra.mxu0 %v2135_v60  ;;  %v2325_v49 = vsub.f32 %v296_v43, %v2322_v45  ;;  %v294_v51 = vld [vmem:[#allocation8 + $0x68] sm:$0xff] }
  0x9b   : > { %972 = vmatpush.msra.mxu3 %v2064_v63  ;;  %919 = vmatpush.msra.mxu2 %v2084_v12  ;;  %v2335_v56 = vand.u32 4294901760, %v294_v51 }
  0x9c   : > { %862 = vmatpush.msra.mxu1 %v2039_v54  ;;  %1004 = vmatpush.msrb.mxu0 %v2322_v45  ;;  %v1046_v52 = vand.u32 4294901760, %v2325_v49  ;;  %v2333_v54 = vsub.f32 %v295_v46, %v2327_v50 }
  0x9d   : > { %974 = vmatpush.msra.mxu3 %v2086_v13  ;;  %923 = vmatpush.msra.mxu2 %v2102_v32  ;;  %v2345_v62 = vsub.f32 %v294_v51, %v2335_v56 }
  0x9e   : > { %864 = vmatpush.msra.mxu1 %v2064_v63  ;;  %1006 = vmatpush.msrb.mxu0 %v2327_v50  ;;  %v1052_v59 = vand.u32 4294901760, %v2333_v54  ;;  %v2347_v63 = vand.u32 4294901760, %v293_v57 }
  0x9f   : > { %976 = vmatpush.msra.mxu3 %v2091_v26  ;;  %927 = vmatpush.msra.mxu2 %v2108_v39 }
  0xa0   : > { %866 = vmatpush.msra.mxu1 %v2086_v13  ;;  %1008 = vmatpush.msrb.mxu0 %v2335_v56  ;;  %v1053_v6 = vsub.f32 %v2333_v54, %v1052_v59  ;;  %v2357_v12 = vsub.f32 %v293_v57, %v2347_v63  ;;  %v2361_v13 = vand.u32 4294901760, %v292_v0 }
  0xa1   : > { %931 = vmatpush.msra.mxu2 %v2132_v61  ;;  %v2382_v61 = vand.u32 4294901760, %v290_v42 }
  0xa2   : > { %868 = vmatpush.msra.mxu1 %v2091_v26  ;;  %1010 = vmatpush.msrb.mxu0 %v2347_v63  ;;  %v1054_v26 = vand.u32 4294901760, %v1053_v6  ;;  %v1064_v32 = vand.u32 4294901760, %v2357_v12  ;;  %v2372_v39 = vsub.f32 %v292_v0, %v2361_v13  ;;  %v283_v0 = vld [vmem:[#allocation8 + $0x10] sm:$0xff] }
  0xa3   : > { %935 = vmatpush.msra.mxu2 %v2146_v7  ;;  %v1058_v7 = vand.u32 4294901760, %v2345_v62  ;;  %v2389_v31 = vsub.f32 %v290_v42, %v2382_v61  ;;  %v282_v42 = vld [vmem:[#allocation8 + $0x8] sm:$0xff] }
  0xa4   : > { %1012 = vmatpush.msrb.mxu0 %v2361_v13  ;;  %v1065_v48 = vsub.f32 %v2357_v12, %v1064_v32  ;;  %v1070_v60 = vand.u32 4294901760, %v2372_v39 }
  0xa5   : > { %939 = vmatpush.msra.mxu2 %v2157_v58  ;;  %v1047_v58 = vsub.f32 %v2325_v49, %v1046_v52  ;;  %v1059_v30 = vsub.f32 %v2345_v62, %v1058_v7  ;;  %v1082_v9 = vand.u32 4294901760, %v2389_v31 }
  0xa6   : > { %1014 = vmatpush.msrb.mxu0 %v2368_v36  ;;  %v1066_v1 = vand.u32 4294901760, %v1065_v48  ;;  %v1071_v3 = vsub.f32 %v2372_v39, %v1070_v60 }
  0xa7   : > { %v1048_v2 = vand.u32 4294901760, %v1047_v58  ;;  %v1060_v47 = vand.u32 4294901760, %v1059_v30 }
  0xa8   : > { %1016 = vmatpush.msrb.mxu0 %v2382_v61  ;;  %v1072_v14 = vand.u32 4294901760, %v1071_v3  ;;  %v2479_v3 = vand.u32 4294901760, %v282_v42 }
  0xa9   : > { %1049 = vmatpush.msrb.mxu1 %v1048_v2 }
  0xaa   : > { %1018 = vmatpush.msrb.mxu0 %v2391_v44 }
  0xab   : > { %1055 = vmatpush.msrb.mxu1 %v1054_v26  ;;  %v2465_v26 = vand.u32 4294901760, %v283_v0 }
  0xac   : > { %1020 = vmatpush.msrb.mxu0 %v2406_v11 }
  0xad   : > { %1061 = vmatpush.msrb.mxu1 %v1060_v47 }
  0xaf   : > { %1067 = vmatpush.msrb.mxu1 %v1066_v1  ;;  %v2475_v1 = vsub.f32 %v283_v0, %v2465_v26 }
  0xb1   : > { %1073 = vmatpush.msrb.mxu1 %v1072_v14 }
  0xdc   : > { %v335_v16 = vpop.f32.mrf.mxu0 }
  0xe0   : > { %v436_v15 = vpop.f32.mrf.mxu1  ;;  %v529_v21 = vpop.f32.mrf.mxu3 }
  0xe1   : > { %v437_v17 = vadd.f32 %v436_v15, %v335_v16  ;;  %v287_v15 = vld [vmem:[#allocation8 + $0x30] sm:$0xff]  ;;  %v1078_v16 = vand.u32 4294901760, %v1077_v5 }
  0xe2   : > { %v490_v19 = vpop.f32.mrf.mxu2 }
  0xe3   : > { %v491_v20 = vadd.f32 %v490_v19, %v437_v17  ;;  %v1083_v17 = vsub.f32 %v2389_v31, %v1082_v9  ;;  %v1088_v19 = vand.u32 4294901760, %v2404_v10  ;;  %1079 = vmatpush.msrb.mxu1 %v1078_v16 }
  0xe5   : > { %v530_v22 = vadd.f32 %v529_v21, %v491_v20  ;;  %v2416_v20 = vsub.f32 %v288_v4, %v2406_v11  ;;  %v2419_v21 = vand.u32 4294901760, %v287_v15  ;;  %v281_v4 = vld [vmem:[#allocation8] sm:$0xff] }
  0xe6   : > { %v2486_v16 = vand.u32 4294901760, %v281_v4 }
  0xe7   : > { %1022 = vmatpush.msrb.mxu0 %v2419_v21 }
  0xf8   : > { %v598_v23 = vpop.f32.mrf.mxu0 }
  0xf9   : > { %v599_v24 = vadd.f32 %v598_v23, %v530_v22  ;;  %v286_v22 = vld [vmem:[#allocation8 + $0x28] sm:$0xff]  ;;  %v1084_v23 = vand.u32 4294901760, %v1083_v17  ;;  %v1129_v17 = vsub.f32 %v282_v42, %v2479_v3 }
  0xfb   : > { %1085 = vmatpush.msrb.mxu1 %v1084_v23 }
 0x100   : > { %v635_v25 = vpop.f32.mrf.mxu1 }
 0x101   : > { %v636_v27 = vadd.f32 %v635_v25, %v599_v24  ;;  %v1089_v24 = vsub.f32 %v2404_v10, %v1088_v19  ;;  %v1094_v25 = vand.u32 4294901760, %v2416_v20 }
 0x103   : > { %v638_v28 = vmul.f32 0.03125, %v636_v27  ;;  %v2426_v27 = vand.u32 4294901760, %v286_v22 }
 0x105   : > { %v2318_v33 = vsub.f32 %v2614_v29, %v638_v28  ;;  %v2431_v28 = vsub.f32 %v287_v15, %v2419_v21  ;;  %v285_v29 = vld [vmem:[#allocation8 + $0x20] sm:$0xff]  ;;  %1024 = vmatpush.msrb.mxu0 %v2426_v27  ;;  %v1124_v15 = vand.u32 4294901760, %v2475_v1 }
 0x107   : > { %v640_v34 = vmul.f32 %v2318_v33, %v2318_v33  ;;  %v1125_v23 = vsub.f32 %v2475_v1, %v1124_v15 }
 0x109   : > { %v673_v35 = vand.u32 4294901760, %v640_v34 }
 0x10b   : > { %v674_v37 = vsub.f32 %v640_v34, %v673_v35  ;;  %779 = vmatmul.f32.vlgmr.msrb.gmra.mxu3 %v673_v35  ;;  %v1090_v34 = vand.u32 4294901760, %v1089_v24  ;;  %v1135_v24 = vsub.f32 %v281_v4, %v2486_v16 }
 0x10c   : > { %1200 = vmatpush.msrb.mxu3 %v2322_v45 }
 0x10d   : > { %833 = vmatmul.f32.vlgmr.msra.gmra.mxu0 %v674_v37  ;;  %v675_v38 = vand.u32 4294901760, %v674_v37  ;;  %1091 = vmatpush.msrb.mxu1 %v1090_v34  ;;  %v1126_v34 = vand.u32 4294901760, %v1125_v23 }
 0x10e   : > { %1202 = vmatpush.msrb.mxu3 %v2327_v50 }
 0x10f   : > { %872 = vmatmul.f32.vlgmr.msra.gmra.mxu1 %v675_v38  ;;  %v676_v40 = vsub.f32 %v674_v37, %v675_v38  ;;  %v2438_v37 = vsub.f32 %v286_v22, %v2426_v27  ;;  %v2440_v38 = vand.u32 4294901760, %v285_v29 }
 0x110   : > { %1204 = vmatpush.msrb.mxu3 %v2335_v56 }
 0x111   : > { %v677_v41 = vand.u32 4294901760, %v676_v40  ;;  %v1100_v40 = vand.u32 4294901760, %v2431_v28  ;;  %v1106_v46 = vand.u32 4294901760, %v2438_v37  ;;  %v2448_v51 = vsub.f32 %v285_v29, %v2440_v38  ;;  %1026 = vmatpush.msrb.mxu0 %v2440_v38 }
 0x112   : > { %1206 = vmatpush.msrb.mxu3 %v2347_v63  ;;  %v1130_v29 = vand.u32 4294901760, %v1129_v17 }
 0x113   : > { %678 = vmatmul.f32.vlgmr.msrb.gmra.mxu2 %v677_v41  ;;  %978 = vmatmul.f32.vlgmr.msra.gmra.mxu3 %v673_v35  ;;  %v284_v41 = vld [vmem:[#allocation8 + $0x18] sm:$0xff]  ;;  %v1101_v58 = vsub.f32 %v2431_v28, %v1100_v40  ;;  %v1107_v2 = vsub.f32 %v2438_v37, %v1106_v46  ;;  %v1112_v6 = vand.u32 4294901760, %v2448_v51 }
 0x114   : > { %1147 = vmatpush.msrb.mxu2 %v2325_v49  ;;  %1208 = vmatpush.msrb.mxu3 %v2361_v13  ;;  %v2450_v57 = vand.u32 4294901760, %v284_v41 }
 0x115   : > { %v1102_v30 = vand.u32 4294901760, %v1101_v58  ;;  %v1108_v47 = vand.u32 4294901760, %v1107_v2  ;;  %v1113_v48 = vsub.f32 %v2448_v51, %v1112_v6 }
 0x116   : > { %1150 = vmatpush.msrb.mxu2 %v2333_v54  ;;  %1210 = vmatpush.msrb.mxu3 %v2368_v36  ;;  %v2463_v18 = vsub.f32 %v284_v41, %v2450_v57  ;;  %v1131_v41 = vsub.f32 %v1129_v17, %v1130_v29 }
 0x117   : > { %1028 = vmatpush.msrb.mxu0 %v2450_v57  ;;  %v1114_v5 = vand.u32 4294901760, %v1113_v48 }
 0x118   : > { %1153 = vmatpush.msrb.mxu2 %v2345_v62  ;;  %1212 = vmatpush.msrb.mxu3 %v2382_v61  ;;  %v1118_v8 = vand.u32 4294901760, %v2463_v18  ;;  %v1132_v58 = vand.u32 4294901760, %v1131_v41 }
 0x119   : > { %1030 = vmatpush.msrb.mxu0 %v2465_v26 }
 0x11a   : > { %1156 = vmatpush.msrb.mxu2 %v2357_v12  ;;  %1214 = vmatpush.msrb.mxu3 %v2391_v44  ;;  %v1119_v14 = vsub.f32 %v2463_v18, %v1118_v8 }
 0x11b   : > { %941 = vmatmul.f32.vlgmr.msra.gmra.mxu2 %v673_v35  ;;  %v1095_v35 = vsub.f32 %v2416_v20, %v1094_v25  ;;  %1032 = vmatpush.msrb.mxu0 %v2479_v3 }
 0x11c   : > { %1159 = vmatpush.msrb.mxu2 %v2372_v39  ;;  %1216 = vmatpush.msrb.mxu3 %v2406_v11  ;;  %v1120_v22 = vand.u32 4294901760, %v1119_v14 }
 0x11d   : > { %v1096_v43 = vand.u32 4294901760, %v1095_v35  ;;  %1034 = vmatpush.msrb.mxu0 %v2486_v16  ;;  %v1136_v35 = vand.u32 4294901760, %v1135_v24 }
 0x11e   : > { %1162 = vmatpush.msrb.mxu2 %v2380_v53  ;;  %1218 = vmatpush.msrb.mxu3 %v2419_v21 }
 0x11f   : > { %1097 = vmatpush.msrb.mxu1 %v1096_v43  ;;  %1241 = vmatpush.msra.mxu0 %v1046_v52  ;;  %v1137_v43 = vsub.f32 %v1135_v24, %v1136_v35 }
 0x120   : > { %1165 = vmatpush.msrb.mxu2 %v2389_v31  ;;  %1220 = vmatpush.msrb.mxu3 %v2426_v27 }
 0x121   : > { %1103 = vmatpush.msrb.mxu1 %v1102_v30  ;;  %1245 = vmatpush.msra.mxu0 %v1052_v59  ;;  %v1138_v0 = vand.u32 4294901760, %v1137_v43 }
 0x122   : > { %1168 = vmatpush.msrb.mxu2 %v2404_v10  ;;  %1222 = vmatpush.msrb.mxu3 %v2440_v38 }
 0x123   : > { %1109 = vmatpush.msrb.mxu1 %v1108_v47  ;;  %1249 = vmatpush.msra.mxu0 %v1058_v7 }
 0x124   : > { %1171 = vmatpush.msrb.mxu2 %v2416_v20  ;;  %1224 = vmatpush.msrb.mxu3 %v2450_v57 }
 0x125   : > { %1115 = vmatpush.msrb.mxu1 %v1114_v5  ;;  %1253 = vmatpush.msra.mxu0 %v1064_v32 }
 0x126   : > { %1174 = vmatpush.msrb.mxu2 %v2431_v28  ;;  %1226 = vmatpush.msrb.mxu3 %v2465_v26 }
 0x127   : > { %1121 = vmatpush.msrb.mxu1 %v1120_v22  ;;  %1257 = vmatpush.msra.mxu0 %v1070_v60 }
 0x128   : > { %1177 = vmatpush.msrb.mxu2 %v2438_v37  ;;  %1228 = vmatpush.msrb.mxu3 %v2479_v3 }
 0x129   : > { %1127 = vmatpush.msrb.mxu1 %v1126_v34  ;;  %1261 = vmatpush.msra.mxu0 %v1076_v55 }
 0x12a   : > { %1180 = vmatpush.msrb.mxu2 %v2448_v51  ;;  %1230 = vmatpush.msrb.mxu3 %v2486_v16 }
 0x12b   : > { %1133 = vmatpush.msrb.mxu1 %v1132_v58  ;;  %1265 = vmatpush.msra.mxu0 %v1082_v9 }
 0x12c   : > { %1183 = vmatpush.msrb.mxu2 %v2463_v18 }
 0x12d   : > { %1139 = vmatpush.msrb.mxu1 %v1138_v0  ;;  %1269 = vmatpush.msra.mxu0 %v1088_v19 }
 0x12e   : > { %1186 = vmatpush.msrb.mxu2 %v2475_v1  ;;  %v1564_v1 = vld [vmem:[#allocation5] ss:$0 sm:$0xff] }
 0x12f   : > { %1308 = vmatpush.msra.mxu1 %v2322_v45  ;;  %1273 = vmatpush.msra.mxu0 %v1094_v25 }
 0x130   : > { %1189 = vmatpush.msrb.mxu2 %v1129_v17 }
 0x131   : > { %1310 = vmatpush.msra.mxu1 %v2327_v50  ;;  %1277 = vmatpush.msra.mxu0 %v1100_v40 }
 0x132   : > { %1192 = vmatpush.msrb.mxu2 %v1135_v24 }
 0x133   : > { %1312 = vmatpush.msra.mxu1 %v2335_v56  ;;  %1281 = vmatpush.msra.mxu0 %v1106_v46 }
 0x135   : > { %1314 = vmatpush.msra.mxu1 %v2347_v63  ;;  %1285 = vmatpush.msra.mxu0 %v1112_v6 }
 0x137   : > { %1316 = vmatpush.msra.mxu1 %v2361_v13  ;;  %1289 = vmatpush.msra.mxu0 %v1118_v8 }
 0x139   : > { %1318 = vmatpush.msra.mxu1 %v2368_v36  ;;  %1293 = vmatpush.msra.mxu0 %v1124_v15 }
 0x13b   : > { %1320 = vmatpush.msra.mxu1 %v2382_v61  ;;  %1297 = vmatpush.msra.mxu0 %v1130_v29 }
 0x13d   : > { %1322 = vmatpush.msra.mxu1 %v2391_v44  ;;  %1301 = vmatpush.msra.mxu0 %v1136_v35 }
 0x13f   : > { %1324 = vmatpush.msra.mxu1 %v2406_v11 }
 0x141   : > { %1326 = vmatpush.msra.mxu1 %v2419_v21 }
 0x143   : > { %1328 = vmatpush.msra.mxu1 %v2426_v27 }
 0x145   : > { %1330 = vmatpush.msra.mxu1 %v2440_v38 }
 0x147   : > { %1332 = vmatpush.msra.mxu1 %v2450_v57 }
 0x149   : > { %1334 = vmatpush.msra.mxu1 %v2465_v26 }
 0x14b   : > { %1336 = vmatpush.msra.mxu1 %v2479_v3 }
 0x14d   : > { %1338 = vmatpush.msra.mxu1 %v2486_v16 }
 0x18a   : > { %v834_v59 = vpop.f32.mrf.mxu0 }
 0x18c   : > { %v873_v45 = vpop.f32.mrf.mxu1 }
 0x18e   : > { %v780_v49 = vpop.f32.mrf.mxu3 }
 0x196   : > { %v679_v52 = vpop.f32.mrf.mxu2  ;;  %v979_v12 = vpop.f32.mrf.mxu3 }
 0x197   : > { %v781_v54 = vadd.f32 %v780_v49, %v679_v52 }
 0x199   : > { %v835_v62 = vadd.f32 %v834_v59, %v781_v54 }
 0x19b   : > { %v874_v50 = vadd.f32 %v873_v45, %v835_v62 }
 0x19e   : > { %v942_v7 = vpop.f32.mrf.mxu2 }
 0x19f   : > { %v943_v56 = vadd.f32 %v942_v7, %v874_v50 }
 0x1a1   : > { %v980_v63 = vadd.f32 %v979_v12, %v943_v56 }
 0x1a3   : > { %v982_v13 = vmul.f32 0.03125, %v980_v63 }
 0x1a5   : > { %v983_v32 = vadd.f32 1e-05, %v982_v13 }
 0x1a7   : > { %1565 = vrsqrt.f32 %v983_v32  ;;  %vm990_vm1 = vweird.f32 %v983_v32 }
 0x1ad   : > { %v1566_v36 = vpop.eup %1565 }
 0x1ae   : > { %v985_v39 = vmul.f32 %v1566_v36, %v983_v32  ;;  %vm991_vm0 = vweird.f32 %v1566_v36 }
 0x1af   : > { %vm992_vm2 = vmor %vm990_vm1, %vm991_vm0 }
 0x1b0   : > { %v986_v53 = vmul.f32 %v1566_v36, %v985_v39 }
 0x1b2   : > { %v987_v61 = vmul.f32 0.5, %v986_v53 }
 0x1b4   : > { %v988_v60 = vsub.f32 1.5, %v987_v61 }
 0x1b6   : > { %v989_v55 = vmul.f32 %v1566_v36, %v988_v60 }
 0x1b8   : > { %v993_v31 = vsel %vm992_vm2, %v1566_v36, %v989_v55 }
 0x1b9   : > { %v994_v44 = vmul.f32 %v993_v31, %v2318_v33 }
 0x1bb   : > { %v996_v9 = vsel %vm995_vm3, %v994_v44, 0.0 }
 0x1bc   : > { %v997_v10 = vrot.slane %v996_v9, 4 }
 0x1be   : > { %v998_v11 = vadd.f32 %v997_v10, %v996_v9 }
 0x1c0   : > { %v999_v19 = vrot.slane %v998_v11, 2 }
 0x1c2   : > { %v1000_v20 = vadd.f32 %v999_v19, %v998_v11 }
 0x1c4   : > { %v1001_v21 = vrot.slane %v1000_v20, 1 }
 0x1c6   : > { %v1002_v25 = vadd.f32 %v1001_v21, %v1000_v20 }
 0x1c8   : > { %v1035_v27 = vand.u32 4294901760, %v1002_v25 }
 0x1ca   : > { %1141 = vmatmul.f32.vlgmr.msrb.gmra.mxu1 %v1035_v27  ;;  %v1036_v28 = vsub.f32 %v1002_v25, %v1035_v27 }
 0x1cc   : > { %1195 = vmatmul.f32.vlgmr.msrb.gmra.mxu2 %v1036_v28  ;;  %v1037_v37 = vand.u32 4294901760, %v1036_v28 }
 0x1ce   : > { %1234 = vmatmul.f32.vlgmr.msrb.gmra.mxu3 %v1037_v37  ;;  %v1038_v38 = vsub.f32 %v1036_v28, %v1037_v37 }
 0x1d0   : > { %v1039_v40 = vand.u32 4294901760, %v1038_v38 }
 0x1d2   : > { %1040 = vmatmul.f32.vlgmr.msrb.gmra.mxu0 %v1039_v40  ;;  %1340 = vmatmul.f32.vlgmr.msra.gmra.mxu1 %v1035_v27 }
 0x1da   : > { %1303 = vmatmul.f32.vlgmr.msra.gmra.mxu0 %v1035_v27 }
 0x247   : > { %v1142_v33 = vpop.f32.mrf.mxu1 }
 0x24f   : > { %v1041_v46 = vpop.f32.mrf.mxu0  ;;  %v1196_v57 = vpop.f32.mrf.mxu2 }
 0x250   : > { %v1143_v51 = vadd.f32 %v1142_v33, %v1041_v46  ;;  %v1341_v42 = vpop.f32.mrf.mxu1 }
 0x251   : > { %v1235_v6 = vpop.f32.mrf.mxu3 }
 0x252   : > { %v1197_v2 = vadd.f32 %v1196_v57, %v1143_v51 }
 0x254   : > { %v1236_v18 = vadd.f32 %v1235_v6, %v1197_v2 }
 0x257   : > { %v1304_v26 = vpop.f32.mrf.mxu0 }
 0x258   : > { %v1305_v30 = vadd.f32 %v1304_v26, %v1236_v18 }
 0x25a   : > { %v1342_v47 = vadd.f32 %v1341_v42, %v1305_v30 }
 0x25c   : > { %v1344_v48 = vmul.f32 0.125, %v1342_v47 }
 0x25e   : > { %v1345_v8 = vperm.slane %v1344_v48, 0 }
 0x260   : > { %v1346_v3 = vsub.f32 %v994_v44, %v1345_v8 }
 0x262   : > { %v1350_v4 = vmul.f32 %v1564_v1, %v1346_v3 }
 0x264   : > { %1351 = vst [vmem:[%s262_s12] sm:$0x3] %v1350_v4 }
 0x265   : > { %1714 = shalt.err (!%p1711_p11)
}
 0x266   : > { %1499 = dma.vmem_to_hbm [thread:$0]  (%p1875_p3), %s1366_s13, 32, %s1368_s14, %s1353_s20  }
 0x267 PF: > { %s1379_s29 = sand.u32 1, %s1749_s15   ;;  %p2615_p12 = scmp.ge.s32.totalorder %s1761_s18, 2 }
 0x268   : > { %s1380_s8 = scalar_lea.sflag [#allocation4], %s1379_s29 }
 0x269   : > { %p1516_p13 = pnand %p2615_p12, %p1828_p6 }
 0x26b   : > { %p1517_p0 = pneg %p1516_p13 }
 0x26d   : > { %1744 = dma.done.wait (%p1517_p0), %s1380_s8, 32  }
 0x26e   : > { %1746 = vsyncadd (%p1517_p0), %s1380_s8, 4294967264  ;;  %p19_p5 = scmp.ge.s32.totalorder %s1862_s23, 4   ;;  %s2616_s15 = smov %s1753_s16 }
 0x26f   : > { %s2617_s16 = smov %s1757_s17  ;;  %s2618_s17 = smov %s1871_s27 }
 0x270   : > { %s2619_s18 = smov %s1862_s23  ;;  %21 = sbr.rel (!%p19_p5) target bundleno = 7 (0x7), region = 93 }
 0x275   :  { %1386 = vsyncpa [#allocation3], 1 }
 0x276   :  { %1388 = vsyncpa [#allocation3 + $0x1], 1 }
 0x277   :  { %1389 = vsyncpa [#allocation6], 1 }
 0x278   :  { %1390 = vsyncpa [#allocation9], 1 }
 0x279   :  { %1391 = vsyncpa [#allocation4], 1 }
 0x27a   :  { %1393 = vsyncpa [#allocation4 + $0x1], 1 }

</bundles_post_ra>
